<compile_context>
chip_gen: v6e
topology: v6e:2x2x1
jax: 0.10.0
libtpu: 0.0.40
codegen_flags: <defaults>
</compile_context>

<pallas_src>
import math

import jax
import jax.numpy as jnp
from jax.experimental import pallas as pl
from jax.experimental.pallas import tpu as pltpu

_GELU_C = math.sqrt(2.0 / math.pi)
_LN_EPS = 1e-12


def _round_up(x, m):
    return (x + m - 1) // m * m


def _vmem_capacity_bytes():
    """Physical VMEM per TensorCore; conservative fallback if the query fails."""
    try:
        return int(pltpu.get_tpu_info().vmem_capacity_bytes)
    except Exception:  # query-only helper; safe conservative default (v7x per-TC)
        return 64 * 1024 * 1024


def _choose_tile_rows(rows, tile_rows, vmem_cap):
    """Row tile TM: MXU-aligned (multiple of 128), generation-aware, >=2 grid steps."""
    if rows <= 256:
        # One small tile covering all rows; multiple of 16 covers bf16 sublane packing.
        return _round_up(max(rows, 16), 16)
    if tile_rows is None:
        # 512 on 128 MiB-VMEM chips (v5e/v6e); 256 on v7x (64 MiB VMEM, 2 TCs/chip).
        base = 512 if vmem_cap >= (96 << 20) else 256
    else:
        base = max(int(tile_rows), 128)
    base = _round_up(base, 128)
    # Keep at least 2 grid steps so a dual-TensorCore chip can split the
    # "parallel" row axis instead of idling one core.
    while base > 128 and rows <= base:
        base //= 2
    return base


def _choose_inter_chunk(inter, requested):
    """Intermediate-dim chunk: a lane-aligned (multiple of 128) divisor of `inter`."""
    if inter % 128 != 0 or int(requested) >= inter:
        return inter
    c = _round_up(max(int(requested), 128), 128)
    while c < inter and inter % c != 0:
        c += 128
    return min(c, inter)


def _make_ffn_kernel(inter, i_chunk):
    n_chunks = inter // i_chunk
    offsets = [c * i_chunk for c in range(n_chunks)]  # static -> zero-cost ref slices

    def kernel(x_ref, w1_ref, b1_ref, w2_ref, b2_ref, gamma_ref, beta_ref,
               o_ref, acc_ref):
        # x_ref:   (TM, H) tile of token rows (bf16 or f32)
        # w1_ref:  (H, I)  dense1 weight (in, out) — resident, single-buffered
        # w2_ref:  (I, H)  dense2 weight (in, out) — resident, single-buffered
        # b1/b2/gamma/beta: (1, I) / (1, H)
        # acc_ref: (TM, H) f32 VMEM scratch accumulator
        x = x_ref[...]
        x32 = x.astype(jnp.float32)
        x_mxu = x if x.dtype == w1_ref.dtype else x.astype(w1_ref.dtype)

        # Fold the residual and the dense2 bias into the accumulator once.
        acc_ref[...] = x32 + b2_ref[...].astype(jnp.float32)

        # Chunked intermediate dim: dense1 chunk -> GELU chunk -> dense2 partial.
        # Fully unrolled straight-line code lets the scheduler overlap GELU
        # (VPU/EUP) of one chunk with the MXU matmuls of its neighbours, and the
        # f32 intermediate is only (TM, i_chunk).
        for off in offsets:
            h = jnp.dot(x_mxu, w1_ref[:, off:off + i_chunk],
                        preferred_element_type=jnp.float32)
            h = h + b1_ref[:, off:off + i_chunk].astype(jnp.float32)
            # tanh-GELU in f32 (matches the PyTorch module exactly).
            h = 0.5 * h * (1.0 + jnp.tanh(_GELU_C * (h + 0.044715 * (h * h * h))))
            acc_ref[...] += jnp.dot(h.astype(w2_ref.dtype),
                                    w2_ref[off:off + i_chunk, :],
                                    preferred_element_type=jnp.float32)

        # TODO(synk): dropout is identity here (inference/eval semantics); training
        # mode would draw a mask with pltpu.prng_seed / pltpu.prng_random_bits.

        # Residual is already in the accumulator; LayerNorm over the hidden axis,
        # eps=1e-12, all in f32.  Single-pass statistics (sum + sum-of-squares).
        y = acc_ref[...]
        inv_h = 1.0 / y.shape[-1]
        s1 = jnp.sum(y, axis=-1, keepdims=True)
        s2 = jnp.sum(y * y, axis=-1, keepdims=True)
        mean = s1 * inv_h
        var = jnp.maximum(s2 * inv_h - mean * mean, 0.0)
        y_norm = (y - mean) * jax.lax.rsqrt(var + _LN_EPS)
        o_ref[...] = (y_norm * gamma_ref[...].astype(jnp.float32)
                      + beta_ref[...].astype(jnp.float32)).astype(o_ref.dtype)

    return kernel


def _build_ffn_call(rows_p, tm, hidden, inter, i_chunk, x_dtype, w_dtype,
                    vmem_cap, single_buffer_weights):
    """Builds the pallas_call for padded row count rows_p and row tile tm."""
    if single_buffer_weights:
        def const_spec(shape):
            # Constant-index blocks never change across the grid -> a single
            # buffer halves their VMEM footprint.
            return pl.BlockSpec(shape, lambda i: (0, 0), pipeline_mode=pl.Buffered(1))
    else:
        def const_spec(shape):
            return pl.BlockSpec(shape, lambda i: (0, 0))

    grid = (rows_p // tm,)
    xb = jnp.dtype(x_dtype).itemsize
    wb = jnp.dtype(w_dtype).itemsize

    weight_bytes = 2 * hidden * inter * wb + (inter + 3 * hidden) * 4
    io_bytes = 2 * rows_p * hidden * xb  # x in + out
    cost = pl.CostEstimate(
        flops=4 * rows_p * hidden * inter,      # two matmuls, 2 flops per MAC
        transcendentals=rows_p * inter,         # tanh inside GELU
        bytes_accessed=weight_bytes + io_bytes,
    )

    wbuf = 1 if single_buffer_weights else 2
    est_vmem = (wbuf * weight_bytes
                + 2 * 2 * tm * hidden * xb       # double-buffered x + out tiles
                + tm * hidden * 4                # f32 accumulator scratch
                + 2 * tm * i_chunk * 4)          # f32 GELU chunk (+ headroom)
    # Generation-aware cap: never ask for more than physical VMEM minus headroom.
    ceiling = max(vmem_cap - (8 << 20), 16 << 20)
    vmem_limit = int(min(max(2 * est_vmem, 32 << 20), ceiling))

    return pl.pallas_call(
        _make_ffn_kernel(inter, i_chunk),
        out_shape=jax.ShapeDtypeStruct((rows_p, hidden), x_dtype),
        grid_spec=pltpu.PrefetchScalarGridSpec(
            num_scalar_prefetch=0,
            grid=grid,
            in_specs=[
                pl.BlockSpec((tm, hidden), lambda i: (i, 0)),   # x rows (pipelined)
                const_spec((hidden, inter)),                    # W1 (resident)
                const_spec((1, inter)),                         # b1
                const_spec((inter, hidden)),                    # W2 (resident)
                const_spec((1, hidden)),                        # b2
                const_spec((1, hidden)),                        # gamma
                const_spec((1, hidden)),                        # beta
            ],
            out_specs=pl.BlockSpec((tm, hidden), lambda i: (i, 0)),
            scratch_shapes=[pltpu.VMEM((tm, hidden), jnp.float32)],
        ),
        compiler_params=pltpu.CompilerParams(
            dimension_semantics=("parallel",),
            vmem_limit_bytes=vmem_limit,
        ),
        cost_estimate=cost,
    )


def ffn_forward(x, params, *, tile_rows=None, intermediate_chunk=512,
                matmul_dtype=jnp.bfloat16):
    """x: (batch, seq, hidden).  params: dict of weights (see init_params).

    matmul_dtype controls the MXU operand dtype for both matmuls (weights cast
    once in the wrapper, the x tile cast inside the kernel).  Default bf16:
    ~2-3x MXU throughput and half the resident weight VMEM; accumulation, GELU,
    residual and LayerNorm stay in f32 (x itself is not down-cast, so the f32
    residual path is exact).  Pass matmul_dtype=jnp.float32 for full-precision.
    """
    b, s, hidden = x.shape
    inter = params["w1"].shape[1]
    rows = b * s

    w_dtype = (jnp.dtype(matmul_dtype) if matmul_dtype is not None
               else jnp.dtype(params["w1"].dtype))
    w1 = params["w1"].astype(w_dtype)
    w2 = params["w2"].astype(w_dtype)

    vmem_cap = _vmem_capacity_bytes()
    tm = _choose_tile_rows(rows, tile_rows, vmem_cap)
    i_chunk = _choose_inter_chunk(inter, intermediate_chunk)

    rows_p = _round_up(rows, tm)
    x2d = x.reshape(rows, hidden)
    if rows_p != rows:
        # TODO(synk): mask the ragged tail tile in-kernel (per-tile row count via
        # scalar prefetch) instead of materializing this padded copy.
        x2d = jnp.pad(x2d, ((0, rows_p - rows), (0, 0)))

    args = (x2d, w1, params["b1"], w2, params["b2"], params["gamma"], params["beta"])

    try:
        out2d = _build_ffn_call(rows_p, tm, hidden, inter, i_chunk, x.dtype,
                                w_dtype, vmem_cap, single_buffer_weights=True)(*args)
    except (TypeError, NotImplementedError, pltpu.LoweringException):
        # Narrow fallback only for builds where pipeline_mode=pl.Buffered(1) is
        # unsupported; genuine compile / VMEM failures propagate instead of being
        # silently retried with double-buffered weights.
        out2d = _build_ffn_call(rows_p, tm, hidden, inter, i_chunk, x.dtype,
                                w_dtype, vmem_cap, single_buffer_weights=False)(*args)

    return out2d[:rows].reshape(b, s, hidden)


def init_params(key, hidden, inter, dtype=jnp.float32):
    k1, k2, k3, k4 = jax.random.split(key, 4)
    # Deterministic synthetic init (roughly matching nn.Linear scale).
    return {
        "w1": jax.random.normal(k1, (hidden, inter), dtype) * (1.0 / math.sqrt(hidden)),
        "b1": jax.random.normal(k2, (1, inter), dtype) * 0.02,
        "w2": jax.random.normal(k3, (inter, hidden), dtype) * (1.0 / math.sqrt(inter)),
        "b2": jax.random.normal(k4, (1, hidden), dtype) * 0.02,
        "gamma": jnp.ones((1, hidden), dtype),
        "beta": jnp.zeros((1, hidden), dtype),
    }


def _reference(x, params):
    """Pure-JAX reference of the FFN forward (eval mode), f32 math."""
    x = x.astype(jnp.float32)
    p = {k: v.astype(jnp.float32) for k, v in params.items()}
    h = x @ p["w1"] + p["b1"][0]
    h = 0.5 * h * (1.0 + jnp.tanh(_GELU_C * (h + 0.044715 * h**3)))
    h = h @ p["w2"] + p["b2"][0]
    y = h + x
    mean = jnp.mean(y, axis=-1, keepdims=True)
    var = jnp.mean((y - mean) ** 2, axis=-1, keepdims=True)
    return (y - mean) / jnp.sqrt(var + _LN_EPS) * p["gamma"][0] + p["beta"][0]


if __name__ == "__main__":
    # Small, lane-dense config: batch=2, seq=8, hidden=128, intermediate=512.
    batch, seq, hidden, inter = 2, 8, 128, 512

    key = jax.random.PRNGKey(0)
    kx, kp = jax.random.split(key)
    x = jax.random.normal(kx, (batch, seq, hidden), jnp.float32)
    params = init_params(kp, hidden, inter, jnp.float32)
    ref = _reference(x, params)

    # 1) Full-f32 MXU path: tight check against the pure-JAX reference.
    out = jax.block_until_ready(ffn_forward(x, params, matmul_dtype=jnp.float32))
    assert out.shape == (batch, seq, hidden)
    assert jnp.allclose(out, ref, atol=1e-4, rtol=1e-4), "f32 mismatch vs reference"

    # 2) Default path: bf16 MXU operands, f32 accumulate / GELU / LayerNorm.
    out_bf = jax.block_until_ready(ffn_forward(x, params))
    assert out_bf.shape == (batch, seq, hidden)
    assert jnp.allclose(out_bf, ref, atol=1e-1, rtol=1e-1), "bf16-MXU mismatch"

    # 3) bf16 activations + bf16 params end-to-end, loose tolerance.
    xb = x.astype(jnp.bfloat16)
    pb = {k: v.astype(jnp.bfloat16) for k, v in params.items()}
    outb = jax.block_until_ready(ffn_forward(xb, pb))
    refb = _reference(xb, pb)
    assert outb.shape == (batch, seq, hidden)
    assert jnp.allclose(outb.astype(jnp.float32), refb, atol=1e-1, rtol=1e-1), "bf16 mismatch"

    print("KERNEL_OK")
</pallas_src>

<mosaic_0001>
module attributes {stable_mosaic.version = 11 : i64} {
  func.func @kernel(%arg0: i32, %arg1: memref<16x128xf32, #tpu.memory_space<vmem>>, %arg2: memref<128x512xf32, #tpu.memory_space<vmem>>, %arg3: memref<1x512xf32, #tpu.memory_space<vmem>>, %arg4: memref<512x128xf32, #tpu.memory_space<vmem>>, %arg5: memref<1x128xf32, #tpu.memory_space<vmem>>, %arg6: memref<1x128xf32, #tpu.memory_space<vmem>>, %arg7: memref<1x128xf32, #tpu.memory_space<vmem>>, %arg8: memref<16x128xf32, #tpu.memory_space<vmem>>, %arg9: memref<16x128xf32, #tpu.memory_space<vmem>>) attributes {dimension_semantics = [#tpu.dimension_semantics<parallel>], iteration_bounds = array<i64: 1>, scalar_prefetch = 0 : i64, scratch_operands = 1 : i64, tpu.core_type = #tpu.core_type<tc>, window_params = [{transform_indices = @transform_0, window_bounds = array<i64: 16, 128>}, {pipeline_mode = #tpu.pipeline_mode<synchronous>, transform_indices = @transform_1, window_bounds = array<i64: 128, 512>}, {pipeline_mode = #tpu.pipeline_mode<synchronous>, transform_indices = @transform_2, window_bounds = array<i64: 1, 512>}, {pipeline_mode = #tpu.pipeline_mode<synchronous>, transform_indices = @transform_3, window_bounds = array<i64: 512, 128>}, {pipeline_mode = #tpu.pipeline_mode<synchronous>, transform_indices = @transform_4, window_bounds = array<i64: 1, 128>}, {pipeline_mode = #tpu.pipeline_mode<synchronous>, transform_indices = @transform_5, window_bounds = array<i64: 1, 128>}, {pipeline_mode = #tpu.pipeline_mode<synchronous>, transform_indices = @transform_6, window_bounds = array<i64: 1, 128>}, {transform_indices = @transform_7, window_bounds = array<i64: 16, 128>}]} {
    %c0 = arith.constant 0 : index
    %c0_0 = arith.constant 0 : index
    %0 = vector.load %arg1[%c0, %c0_0] : memref<16x128xf32, #tpu.memory_space<vmem>>, vector<16x128xf32>
    %c0_1 = arith.constant 0 : index
    %c0_2 = arith.constant 0 : index
    %1 = vector.load %arg5[%c0_1, %c0_2] : memref<1x128xf32, #tpu.memory_space<vmem>>, vector<1x128xf32>
    %2 = vector.broadcast %1 : vector<1x128xf32> to vector<16x128xf32>
    %3 = arith.addf %0, %2 : vector<16x128xf32>
    %c0_3 = arith.constant 0 : index
    %c0_4 = arith.constant 0 : index
    %4 = vector.load %arg9[%c0_3, %c0_4] : memref<16x128xf32, #tpu.memory_space<vmem>>, vector<16x128xf32>
    tpu.vector_store %arg9[%c0_3, %c0_4], %3 {strides = array<i32>} : memref<16x128xf32, #tpu.memory_space<vmem>>, vector<16x128xf32>,
    %c0_5 = arith.constant 0 : index
    %c0_6 = arith.constant 0 : index
    %5 = vector.load %arg2[%c0_5, %c0_6] : memref<128x512xf32, #tpu.memory_space<vmem>>, vector<128x512xf32>
    %cst = arith.constant dense<0.000000e+00> : vector<16x512xf32>
    %6 = tpu.matmul %0, %5, %cst {dimension_numbers = #tpu.dot_dimension_numbers<[1], [0], [0], [1], [0, 0, 1, 1], [], []>} : vector<16x128xf32>, vector<128x512xf32>, vector<16x512xf32> -> vector<16x512xf32>
    %c0_7 = arith.constant 0 : index
    %c0_8 = arith.constant 0 : index
    %7 = vector.load %arg3[%c0_7, %c0_8] : memref<1x512xf32, #tpu.memory_space<vmem>>, vector<1x512xf32>
    %8 = vector.broadcast %7 : vector<1x512xf32> to vector<16x512xf32>
    %9 = arith.addf %6, %8 : vector<16x512xf32>
    %cst_9 = arith.constant 5.000000e-01 : f32
    %10 = vector.broadcast %cst_9 : f32 to vector<16x512xf32>
    %11 = arith.mulf %10, %9 : vector<16x512xf32>
    %12 = arith.mulf %9, %9 : vector<16x512xf32>
    %13 = arith.mulf %12, %9 : vector<16x512xf32>
    %cst_10 = arith.constant 4.471500e-02 : f32
    %14 = vector.broadcast %cst_10 : f32 to vector<16x512xf32>
    %15 = arith.mulf %14, %13 : vector<16x512xf32>
    %16 = arith.addf %9, %15 : vector<16x512xf32>
    %cst_11 = arith.constant 0.797884583 : f32
    %17 = vector.broadcast %cst_11 : f32 to vector<16x512xf32>
    %18 = arith.mulf %17, %16 : vector<16x512xf32>
    %19 = math.tanh %18 : vector<16x512xf32>
    %cst_12 = arith.constant 1.000000e+00 : f32
    %20 = vector.broadcast %cst_12 : f32 to vector<16x512xf32>
    %21 = arith.addf %20, %19 : vector<16x512xf32>
    %22 = arith.mulf %11, %21 : vector<16x512xf32>
    %c0_13 = arith.constant 0 : index
    %c0_14 = arith.constant 0 : index
    %23 = vector.load %arg9[%c0_13, %c0_14] : memref<16x128xf32, #tpu.memory_space<vmem>>, vector<16x128xf32>
    %c0_15 = arith.constant 0 : index
    %c0_16 = arith.constant 0 : index
    %24 = vector.load %arg4[%c0_15, %c0_16] : memref<512x128xf32, #tpu.memory_space<vmem>>, vector<512x128xf32>
    %cst_17 = arith.constant dense<0.000000e+00> : vector<16x128xf32>
    %25 = tpu.matmul %22, %24, %cst_17 {dimension_numbers = #tpu.dot_dimension_numbers<[1], [0], [0], [1], [0, 0, 1, 1], [], []>} : vector<16x512xf32>, vector<512x128xf32>, vector<16x128xf32> -> vector<16x128xf32>
    %26 = arith.addf %23, %25 : vector<16x128xf32>
    %c0_18 = arith.constant 0 : index
    %c0_19 = arith.constant 0 : index
    %27 = vector.load %arg9[%c0_18, %c0_19] : memref<16x128xf32, #tpu.memory_space<vmem>>, vector<16x128xf32>
    tpu.vector_store %arg9[%c0_18, %c0_19], %26 {strides = array<i32>} : memref<16x128xf32, #tpu.memory_space<vmem>>, vector<16x128xf32>,
    %c0_20 = arith.constant 0 : index
    %c0_21 = arith.constant 0 : index
    %28 = vector.load %arg9[%c0_20, %c0_21] : memref<16x128xf32, #tpu.memory_space<vmem>>, vector<16x128xf32>
    %cst_22 = arith.constant dense<0.000000e+00> : vector<16xf32>
    %29 = vector.multi_reduction <add>, %28, %cst_22 [1] : vector<16x128xf32> to vector<16xf32>
    %30 = vector.shape_cast %29 : vector<16xf32> to vector<16x1xf32>
    %31 = arith.mulf %28, %28 : vector<16x128xf32>
    %cst_23 = arith.constant dense<0.000000e+00> : vector<16xf32>
    %32 = vector.multi_reduction <add>, %31, %cst_23 [1] : vector<16x128xf32> to vector<16xf32>
    %33 = vector.shape_cast %32 : vector<16xf32> to vector<16x1xf32>
    %cst_24 = arith.constant 7.812500e-03 : f32
    %34 = vector.broadcast %cst_24 : f32 to vector<16x1xf32>
    %35 = arith.mulf %30, %34 : vector<16x1xf32>
    %cst_25 = arith.constant 7.812500e-03 : f32
    %36 = vector.broadcast %cst_25 : f32 to vector<16x1xf32>
    %37 = arith.mulf %33, %36 : vector<16x1xf32>
    %38 = arith.mulf %35, %35 : vector<16x1xf32>
    %39 = arith.subf %37, %38 : vector<16x1xf32>
    %cst_26 = arith.constant 0.000000e+00 : f32
    %40 = vector.broadcast %cst_26 : f32 to vector<16x1xf32>
    %41 = arith.maximumf %39, %40 : vector<16x1xf32>
    %42 = vector.broadcast %35 : vector<16x1xf32> to vector<16x128xf32>
    %43 = arith.subf %28, %42 : vector<16x128xf32>
    %cst_27 = arith.constant 9.99999996E-13 : f32
    %44 = vector.broadcast %cst_27 : f32 to vector<16x1xf32>
    %45 = arith.addf %41, %44 : vector<16x1xf32>
    %46 = math.rsqrt %45 : vector<16x1xf32>
    %47 = vector.broadcast %46 : vector<16x1xf32> to vector<16x128xf32>
    %48 = arith.mulf %43, %47 : vector<16x128xf32>
    %c0_28 = arith.constant 0 : index
    %c0_29 = arith.constant 0 : index
    %49 = vector.load %arg6[%c0_28, %c0_29] : memref<1x128xf32, #tpu.memory_space<vmem>>, vector<1x128xf32>
    %50 = vector.broadcast %49 : vector<1x128xf32> to vector<16x128xf32>
    %51 = arith.mulf %48, %50 : vector<16x128xf32>
    %c0_30 = arith.constant 0 : index
    %c0_31 = arith.constant 0 : index
    %52 = vector.load %arg7[%c0_30, %c0_31] : memref<1x128xf32, #tpu.memory_space<vmem>>, vector<1x128xf32>
    %53 = vector.broadcast %52 : vector<1x128xf32> to vector<16x128xf32>
    %54 = arith.addf %51, %53 : vector<16x128xf32>
    %c0_32 = arith.constant 0 : index
    %c0_33 = arith.constant 0 : index
    %55 = vector.load %arg8[%c0_32, %c0_33] : memref<16x128xf32, #tpu.memory_space<vmem>>, vector<16x128xf32>
    tpu.vector_store %arg8[%c0_32, %c0_33], %54 {strides = array<i32>} : memref<16x128xf32, #tpu.memory_space<vmem>>, vector<16x128xf32>,
    return
  }
  func.func @transform_0(%arg0: i32) -> (i32, i32) {
    %c0_i32 = arith.constant 0 : i32
    %c0_i32_0 = arith.constant 0 : i32
    return %arg0, %c0_i32 : i32, i32
  }
  func.func @transform_1(%arg0: i32) -> (i32, i32) {
    %c0_i32 = arith.constant 0 : i32
    %c0_i32_0 = arith.constant 0 : i32
    %c0_i32_1 = arith.constant 0 : i32
    return %c0_i32, %c0_i32_0 : i32, i32
  }
  func.func @transform_2(%arg0: i32) -> (i32, i32) {
    %c0_i32 = arith.constant 0 : i32
    %c0_i32_0 = arith.constant 0 : i32
    %c0_i32_1 = arith.constant 0 : i32
    return %c0_i32, %c0_i32_0 : i32, i32
  }
  func.func @transform_3(%arg0: i32) -> (i32, i32) {
    %c0_i32 = arith.constant 0 : i32
    %c0_i32_0 = arith.constant 0 : i32
    %c0_i32_1 = arith.constant 0 : i32
    return %c0_i32, %c0_i32_0 : i32, i32
  }
  func.func @transform_4(%arg0: i32) -> (i32, i32) {
    %c0_i32 = arith.constant 0 : i32
    %c0_i32_0 = arith.constant 0 : i32
    %c0_i32_1 = arith.constant 0 : i32
    return %c0_i32, %c0_i32_0 : i32, i32
  }
  func.func @transform_5(%arg0: i32) -> (i32, i32) {
    %c0_i32 = arith.constant 0 : i32
    %c0_i32_0 = arith.constant 0 : i32
    %c0_i32_1 = arith.constant 0 : i32
    return %c0_i32, %c0_i32_0 : i32, i32
  }
  func.func @transform_6(%arg0: i32) -> (i32, i32) {
    %c0_i32 = arith.constant 0 : i32
    %c0_i32_0 = arith.constant 0 : i32
    %c0_i32_1 = arith.constant 0 : i32
    return %c0_i32, %c0_i32_0 : i32, i32
  }
  func.func @transform_7(%arg0: i32) -> (i32, i32) {
    %c0_i32 = arith.constant 0 : i32
    %c0_i32_0 = arith.constant 0 : i32
    return %arg0, %c0_i32 : i32, i32
  }
}

</mosaic_0001>

<bundles_post_ra>
// kernel: tpu_custom_call.1
= control target key start
LH: loop header
LB: loop body
LE: loop exit
PB: predicated region body
PF: predicated region fallthrough
CT: control target
= control target key end

     0   :  { %12 = vsyncpa [#allocation4], 0  ;;  %s1050_s0 = inlined_call_operand.hbm [shape: f32[16,128], index: 0, kind: input, shape index: {}]   ;;  %s1051_s1 = inlined_call_operand.hbm [shape: f32[128,512], index: 1, kind: input, shape index: {}]   ;;  %s1052_s2 = inlined_call_operand.hbm [shape: f32[1,512], index: 2, kind: input, shape index: {}]   ;;  %s1053_s3 = inlined_call_operand.hbm [shape: f32[512,128], index: 3, kind: input, shape index: {}]   ;;  %s1054_s4 = inlined_call_operand.vmem [shape: f32[1,128], index: 4, kind: input, shape index: {}]   ;;  %s1055_s5 = inlined_call_operand.vmem [shape: f32[1,128], index: 5, kind: input, shape index: {}]   ;;  %s1056_s6 = inlined_call_operand.vmem [shape: f32[1,128], index: 6, kind: input, shape index: {}]   ;;  %s1057_s7 = inlined_call_operand.hbm [shape: f32[16,128], index: 7, kind: output, shape index: {}]  }
   0x1   :  { %13 = vsyncpa [#allocation7], 0 }
   0x2   :  { %14 = vsyncpa [#allocation10], 0 }
   0x3   :  { %15 = vsyncpa [#allocation5], 0  ;;  %s911_s24 = smov [#allocation6]  }
   0x4   :  { %s33_s25 = sshll.u32 %s911_s24, 4  ;;  %s34_s25 = int_to_ptr.vmem [resolvable:$true] %s33_s25 }
   0x5   :  { %s811_s26 = scalar_lea.vmem %s34_s25, 8192  ;;  %p816_p1 = scmp.lt.s32.totalorder %s34_s25, %s34_s25 }
   0x6   :  { %p812_p0 = scmp.ne.s32.totalorder %s34_s25, %s811_s26  ;;  %p817_p2 = scmp.lt.s32.totalorder %s811_s26, %s811_s26 }
   0x8   :  { %p818_p3 = por %p817_p2, %p816_p1 }
   0xa   :  { %p819_p4 = pnand %p818_p3, %p812_p0 }
   0xc   :  { %822 = shalt.err (!%p819_p4)
}
   0xd   :  { %s912_s27 = smov 512   ;;  %s913_s28 = smov 32  }
   0xe   :  { %39 = dma.hbm_to_vmem [thread:$0]  %s1051_s1, 8192, %s34_s25, [#allocation7], %s912_s27, %s912_s27, %s913_s28  }
   0xf   :  { %s914_s8 = smov [#allocation3]  }
  0x10   :  { %s21_s9 = sshll.u32 %s914_s8, 4  ;;  %s22_s9 = int_to_ptr.vmem [resolvable:$true] %s21_s9 }
  0x11   :  { %s831_s10 = scalar_lea.vmem %s22_s9, 256  ;;  %p836_p6 = scmp.lt.s32.totalorder %s22_s9, %s22_s9 }
  0x12   :  { %p832_p5 = scmp.ne.s32.totalorder %s22_s9, %s831_s10  ;;  %p837_p7 = scmp.lt.s32.totalorder %s831_s10, %s831_s10 }
  0x14   :  { %p838_p8 = por %p837_p7, %p836_p6 }
  0x16   :  { %p839_p9 = pnand %p838_p8, %p832_p5 }
  0x18   :  { %842 = shalt.err (!%p839_p9)
}
  0x19   :  { %s915_s11 = smov 128   ;;  %s916_s12 = smov 8  }
  0x1a   :  { %27 = dma.hbm_to_vmem [thread:$0]  %s1050_s0, 256, %s22_s9, [#allocation4], %s915_s11, %s915_s11, %s916_s12  }
  0x1b   :  { %s917_s1 = smov [#allocation8]   ;;  %s918_s16 = smov [#allocation9]  }
  0x1c   :  { %s46_s15 = sshll.u32 %s917_s1, 4  ;;  %s55_s17 = sshll.u32 %s918_s16, 4  ;;  %s47_s15 = int_to_ptr.vmem [resolvable:$true] %s46_s15  ;;  %s56_s17 = int_to_ptr.vmem [resolvable:$true] %s55_s17 }
  0x1d   :  { %s851_s18 = scalar_lea.vmem %s47_s15, 64  ;;  %p856_p11 = scmp.lt.s32.totalorder %s47_s15, %s47_s15 }
  0x1e   :  { %p852_p10 = scmp.ne.s32.totalorder %s47_s15, %s851_s18  ;;  %p857_p12 = scmp.lt.s32.totalorder %s851_s18, %s851_s18 }
  0x20   :  { %p858_p13 = por %p857_p12, %p856_p11 }
  0x22   :  { %p859_p0 = pnand %p858_p13, %p852_p10 }
  0x24   :  { %862 = shalt.err (!%p859_p0)
}
  0x25   :  { %49 = dma.hbm_to_vmem [thread:$0]  %s1052_s2, 64, %s47_s15, [#allocation7]  }
  0x26   :  { %s871_s21 = scalar_lea.vmem %s56_s17, 8192  ;;  %p876_p2 = scmp.lt.s32.totalorder %s56_s17, %s56_s17 }
  0x27   :  { %p872_p1 = scmp.ne.s32.totalorder %s56_s17, %s871_s21  ;;  %p877_p3 = scmp.lt.s32.totalorder %s871_s21, %s871_s21 }
  0x29   :  { %p878_p4 = por %p877_p3, %p876_p2 }
  0x2b   :  { %p879_p5 = pnand %p878_p4, %p872_p1 }
  0x2d   :  { %882 = shalt.err (!%p879_p5)
}
  0x2e   :  { %61 = dma.hbm_to_vmem [thread:$0]  %s1053_s3, 8192, %s56_s17, [#allocation10], %s915_s11, %s915_s11, %s916_s12  }
  0x2f   :  { %903 = dma.done.wait [#allocation4], 256  }
  0x30   :  { %904 = vsyncadd [#allocation4], 4294967040 }
  0x31   :  { %905 = dma.done.wait [#allocation7], 8256  }
  0x32   :  { %906 = vsyncadd [#allocation7], 4294959040 }
  0x33   :  { %907 = dma.done.wait [#allocation10], 8192  }
  0x34   :  { %908 = vsyncadd [#allocation10], 4294959104  ;;  %v919_v0 = vmov 0.0   ;;  %v154_v1 = vld [vmem:[#allocation6 + $0x1e8] sm:$0xff]  ;;  %v156_v2 = vld [vmem:[#allocation6 + $0x1f8] sm:$0xff]  ;;  %s920_s26 = smov [#allocation11]  }
  0x35   :  { %243 = vmatprep.mubr.f32.mxu0 %v919_v0  ;;  %320 = vmatprep.mubr.f32.mxu1 %v919_v0  ;;  %v153_v3 = vld [vmem:[#allocation6 + $0x1e0] sm:$0xff]  ;;  %v155_v4 = vld [vmem:[#allocation6 + $0x1f0] sm:$0xff]  ;;  %v150_v5 = vld [vmem:[#allocation6 + $0x1c8] sm:$0xff]  ;;  %s680_s27 = sshll.u32 %s920_s26, 4  ;;  %s681_s27 = int_to_ptr.vmem [resolvable:$true] %s680_s27 }
  0x36   :  { %179 = vmatprep.subr.mxu0 %v154_v1  ;;  %256 = vmatprep.subr.mxu1 %v156_v2  ;;  %v152_v6 = vld [vmem:[#allocation6 + $0x1d8] sm:$0xff]  ;;  %v149_v7 = vld [vmem:[#allocation6 + $0x1c0] sm:$0xff]  ;;  %v151_v8 = vld [vmem:[#allocation6 + $0x1d0] sm:$0xff]  ;;  %s883_s28 = scalar_lea.vmem %s681_s27, 256  ;;  %p888_p7 = scmp.lt.s32.totalorder %s681_s27, %s681_s27 }
  0x37   :  { %180 = vmatpush1.msra.mxu0 %v153_v3  ;;  %257 = vmatpush1.msra.mxu1 %v155_v4  ;;  %v146_v9 = vld [vmem:[#allocation6 + $0x1a8] sm:$0xff]  ;;  %v148_v10 = vld [vmem:[#allocation6 + $0x1b8] sm:$0xff]  ;;  %v145_v11 = vld [vmem:[#allocation6 + $0x1a0] sm:$0xff]  ;;  %p884_p6 = scmp.ne.s32.totalorder %s681_s27, %s883_s28  ;;  %p889_p8 = scmp.lt.s32.totalorder %s883_s28, %s883_s28 }
  0x38   :  { %181 = vmatprep.subr.mxu0 %v150_v5  ;;  %258 = vmatprep.subr.mxu1 %v152_v6  ;;  %v147_v12 = vld [vmem:[#allocation6 + $0x1b0] sm:$0xff]  ;;  %v142_v13 = vld [vmem:[#allocation6 + $0x188] sm:$0xff]  ;;  %v144_v14 = vld [vmem:[#allocation6 + $0x198] sm:$0xff] }
  0x39   :  { %182 = vmatpush1.msra.mxu0 %v149_v7  ;;  %259 = vmatpush1.msra.mxu1 %v151_v8  ;;  %v141_v15 = vld [vmem:[#allocation6 + $0x180] sm:$0xff]  ;;  %v143_v16 = vld [vmem:[#allocation6 + $0x190] sm:$0xff]  ;;  %v138_v17 = vld [vmem:[#allocation6 + $0x168] sm:$0xff]  ;;  %p890_p9 = por %p889_p8, %p888_p7 }
  0x3a   :  { %183 = vmatprep.subr.mxu0 %v146_v9  ;;  %260 = vmatprep.subr.mxu1 %v148_v10  ;;  %v140_v18 = vld [vmem:[#allocation6 + $0x178] sm:$0xff]  ;;  %v137_v19 = vld [vmem:[#allocation6 + $0x160] sm:$0xff]  ;;  %v139_v20 = vld [vmem:[#allocation6 + $0x170] sm:$0xff] }
  0x3b   :  { %184 = vmatpush1.msra.mxu0 %v145_v11  ;;  %261 = vmatpush1.msra.mxu1 %v147_v12  ;;  %v134_v21 = vld [vmem:[#allocation6 + $0x148] sm:$0xff]  ;;  %v136_v22 = vld [vmem:[#allocation6 + $0x158] sm:$0xff]  ;;  %v133_v23 = vld [vmem:[#allocation6 + $0x140] sm:$0xff]  ;;  %p891_p10 = pnand %p890_p9, %p884_p6 }
  0x3c   :  { %185 = vmatprep.subr.mxu0 %v142_v13  ;;  %262 = vmatprep.subr.mxu1 %v144_v14  ;;  %v135_v24 = vld [vmem:[#allocation6 + $0x150] sm:$0xff]  ;;  %v130_v25 = vld [vmem:[#allocation6 + $0x128] sm:$0xff]  ;;  %v132_v26 = vld [vmem:[#allocation6 + $0x138] sm:$0xff] }
  0x3d   :  { %186 = vmatpush1.msra.mxu0 %v141_v15  ;;  %263 = vmatpush1.msra.mxu1 %v143_v16  ;;  %v129_v27 = vld [vmem:[#allocation6 + $0x120] sm:$0xff]  ;;  %v131_v28 = vld [vmem:[#allocation6 + $0x130] sm:$0xff]  ;;  %v126_v29 = vld [vmem:[#allocation6 + $0x108] sm:$0xff] }
  0x3e   :  { %187 = vmatprep.subr.mxu0 %v138_v17  ;;  %264 = vmatprep.subr.mxu1 %v140_v18  ;;  %v128_v30 = vld [vmem:[#allocation6 + $0x118] sm:$0xff]  ;;  %v125_v31 = vld [vmem:[#allocation6 + $0x100] sm:$0xff]  ;;  %v127_v32 = vld [vmem:[#allocation6 + $0x110] sm:$0xff] }
  0x3f   :  { %188 = vmatpush1.msra.mxu0 %v137_v19  ;;  %265 = vmatpush1.msra.mxu1 %v139_v20  ;;  %v122_v33 = vld [vmem:[#allocation6 + $0xe8] sm:$0xff]  ;;  %v124_v34 = vld [vmem:[#allocation6 + $0xf8] sm:$0xff]  ;;  %v121_v35 = vld [vmem:[#allocation6 + $0xe0] sm:$0xff] }
  0x40   :  { %189 = vmatprep.subr.mxu0 %v134_v21  ;;  %266 = vmatprep.subr.mxu1 %v136_v22  ;;  %v123_v36 = vld [vmem:[#allocation6 + $0xf0] sm:$0xff]  ;;  %v118_v37 = vld [vmem:[#allocation6 + $0xc8] sm:$0xff]  ;;  %v120_v38 = vld [vmem:[#allocation6 + $0xd8] sm:$0xff] }
  0x41   :  { %190 = vmatpush1.msra.mxu0 %v133_v23  ;;  %267 = vmatpush1.msra.mxu1 %v135_v24  ;;  %v117_v39 = vld [vmem:[#allocation6 + $0xc0] sm:$0xff]  ;;  %v119_v40 = vld [vmem:[#allocation6 + $0xd0] sm:$0xff]  ;;  %v114_v41 = vld [vmem:[#allocation6 + $0xa8] sm:$0xff] }
  0x42   :  { %191 = vmatprep.subr.mxu0 %v130_v25  ;;  %268 = vmatprep.subr.mxu1 %v132_v26  ;;  %v116_v42 = vld [vmem:[#allocation6 + $0xb8] sm:$0xff]  ;;  %v113_v43 = vld [vmem:[#allocation6 + $0xa0] sm:$0xff]  ;;  %v115_v44 = vld [vmem:[#allocation6 + $0xb0] sm:$0xff] }
  0x43   :  { %192 = vmatpush1.msra.mxu0 %v129_v27  ;;  %269 = vmatpush1.msra.mxu1 %v131_v28  ;;  %v110_v45 = vld [vmem:[#allocation6 + $0x88] sm:$0xff]  ;;  %v112_v46 = vld [vmem:[#allocation6 + $0x98] sm:$0xff]  ;;  %v109_v47 = vld [vmem:[#allocation6 + $0x80] sm:$0xff] }
  0x44   :  { %193 = vmatprep.subr.mxu0 %v126_v29  ;;  %270 = vmatprep.subr.mxu1 %v128_v30  ;;  %v111_v48 = vld [vmem:[#allocation6 + $0x90] sm:$0xff]  ;;  %v106_v49 = vld [vmem:[#allocation6 + $0x68] sm:$0xff]  ;;  %v108_v50 = vld [vmem:[#allocation6 + $0x78] sm:$0xff] }
  0x45   :  { %194 = vmatpush1.msra.mxu0 %v125_v31  ;;  %271 = vmatpush1.msra.mxu1 %v127_v32  ;;  %v105_v51 = vld [vmem:[#allocation6 + $0x60] sm:$0xff]  ;;  %v107_v52 = vld [vmem:[#allocation6 + $0x70] sm:$0xff]  ;;  %v102_v53 = vld [vmem:[#allocation6 + $0x48] sm:$0xff] }
  0x46   :  { %195 = vmatprep.subr.mxu0 %v122_v33  ;;  %272 = vmatprep.subr.mxu1 %v124_v34  ;;  %v104_v54 = vld [vmem:[#allocation6 + $0x58] sm:$0xff]  ;;  %v101_v55 = vld [vmem:[#allocation6 + $0x40] sm:$0xff]  ;;  %v103_v56 = vld [vmem:[#allocation6 + $0x50] sm:$0xff] }
  0x47   :  { %196 = vmatpush1.msra.mxu0 %v121_v35  ;;  %273 = vmatpush1.msra.mxu1 %v123_v36  ;;  %v98_v57 = vld [vmem:[#allocation6 + $0x28] sm:$0xff]  ;;  %v100_v58 = vld [vmem:[#allocation6 + $0x38] sm:$0xff]  ;;  %v97_v59 = vld [vmem:[#allocation6 + $0x20] sm:$0xff] }
  0x48   :  { %197 = vmatprep.subr.mxu0 %v118_v37  ;;  %274 = vmatprep.subr.mxu1 %v120_v38  ;;  %v99_v60 = vld [vmem:[#allocation6 + $0x30] sm:$0xff]  ;;  %v94_v61 = vld [vmem:[#allocation6 + $0x8] sm:$0xff]  ;;  %v96_v62 = vld [vmem:[#allocation6 + $0x18] sm:$0xff] }
  0x49   :  { %198 = vmatpush1.msra.mxu0 %v117_v39  ;;  %275 = vmatpush1.msra.mxu1 %v119_v40  ;;  %v93_v63 = vld [vmem:[#allocation6] sm:$0xff]  ;;  %v95_v1 = vld [vmem:[#allocation6 + $0x10] sm:$0xff]  ;;  %v987_v3 = vld [vmem:[#allocation3 + $0x8] sm:$0xff] }
  0x4a   :  { %199 = vmatprep.subr.mxu0 %v114_v41  ;;  %276 = vmatprep.subr.mxu1 %v116_v42  ;;  %v981_v2 = vld [vmem:[#allocation3] sm:$0xff]  ;;  %v438_v4 = vld [vmem:[#allocation9 + $0xf8] sm:$0xff]  ;;  %v435_v15 = vld [vmem:[#allocation9 + $0xe0] sm:$0xff] }
  0x4b   :  { %200 = vmatpush1.msra.mxu0 %v113_v43  ;;  %277 = vmatpush1.msra.mxu1 %v115_v44  ;;  %v470_v5 = vld [vmem:[#allocation9 + $0x1f8] sm:$0xff]  ;;  %v437_v8 = vld [vmem:[#allocation9 + $0xf0] sm:$0xff]  ;;  %v436_v11 = vld [vmem:[#allocation9 + $0xe8] sm:$0xff] }
  0x4c   :  { %201 = vmatprep.subr.mxu0 %v110_v45  ;;  %278 = vmatprep.subr.mxu1 %v112_v46  ;;  %v422_v6 = vld [vmem:[#allocation9 + $0x78] sm:$0xff]  ;;  %v469_v9 = vld [vmem:[#allocation9 + $0x1f0] sm:$0xff]  ;;  %v468_v12 = vld [vmem:[#allocation9 + $0x1e8] sm:$0xff] }
  0x4d   :  { %202 = vmatpush1.msra.mxu0 %v109_v47  ;;  %279 = vmatpush1.msra.mxu1 %v111_v48  ;;  %v454_v7 = vld [vmem:[#allocation9 + $0x178] sm:$0xff]  ;;  %v421_v10 = vld [vmem:[#allocation9 + $0x70] sm:$0xff]  ;;  %v420_v13 = vld [vmem:[#allocation9 + $0x68] sm:$0xff] }
  0x4e   :  { %203 = vmatprep.subr.mxu0 %v106_v49  ;;  %280 = vmatprep.subr.mxu1 %v108_v50  ;;  %v452_v14 = vld [vmem:[#allocation9 + $0x168] sm:$0xff]  ;;  %v467_v16 = vld [vmem:[#allocation9 + $0x1e0] sm:$0xff]  ;;  %v434_v19 = vld [vmem:[#allocation9 + $0xd8] sm:$0xff] }
  0x4f   :  { %204 = vmatpush1.msra.mxu0 %v105_v51  ;;  %281 = vmatpush1.msra.mxu1 %v107_v52  ;;  %v419_v17 = vld [vmem:[#allocation9 + $0x60] sm:$0xff]  ;;  %v466_v20 = vld [vmem:[#allocation9 + $0x1d8] sm:$0xff]  ;;  %v433_v23 = vld [vmem:[#allocation9 + $0xd0] sm:$0xff] }
  0x50   :  { %205 = vmatprep.subr.mxu0 %v102_v53  ;;  %282 = vmatprep.subr.mxu1 %v104_v54  ;;  %v451_v18 = vld [vmem:[#allocation9 + $0x160] sm:$0xff]  ;;  %v418_v21 = vld [vmem:[#allocation9 + $0x58] sm:$0xff]  ;;  %v465_v24 = vld [vmem:[#allocation9 + $0x1d0] sm:$0xff] }
  0x51   :  { %206 = vmatpush1.msra.mxu0 %v101_v55  ;;  %283 = vmatpush1.msra.mxu1 %v103_v56  ;;  %v450_v22 = vld [vmem:[#allocation9 + $0x158] sm:$0xff]  ;;  %v417_v25 = vld [vmem:[#allocation9 + $0x50] sm:$0xff]  ;;  %v432_v27 = vld [vmem:[#allocation9 + $0xc8] sm:$0xff] }
  0x52   :  { %207 = vmatprep.subr.mxu0 %v98_v57  ;;  %284 = vmatprep.subr.mxu1 %v100_v58  ;;  %v449_v26 = vld [vmem:[#allocation9 + $0x150] sm:$0xff]  ;;  %v464_v28 = vld [vmem:[#allocation9 + $0x1c8] sm:$0xff]  ;;  %v431_v31 = vld [vmem:[#allocation9 + $0xc0] sm:$0xff] }
  0x53   :  { %208 = vmatpush1.msra.mxu0 %v97_v59  ;;  %285 = vmatpush1.msra.mxu1 %v99_v60  ;;  %v416_v29 = vld [vmem:[#allocation9 + $0x48] sm:$0xff]  ;;  %v463_v32 = vld [vmem:[#allocation9 + $0x1c0] sm:$0xff]  ;;  %v430_v35 = vld [vmem:[#allocation9 + $0xb8] sm:$0xff] }
  0x54   :  { %209 = vmatprep.subr.mxu0 %v94_v61  ;;  %286 = vmatprep.subr.mxu1 %v96_v62  ;;  %v448_v30 = vld [vmem:[#allocation9 + $0x148] sm:$0xff]  ;;  %v415_v33 = vld [vmem:[#allocation9 + $0x40] sm:$0xff]  ;;  %v462_v36 = vld [vmem:[#allocation9 + $0x1b8] sm:$0xff] }
  0x55   :  { %210 = vmatpush1.msra.mxu0 %v93_v63  ;;  %287 = vmatpush1.msra.mxu1 %v95_v1  ;;  %v447_v34 = vld [vmem:[#allocation9 + $0x140] sm:$0xff]  ;;  %v414_v37 = vld [vmem:[#allocation9 + $0x38] sm:$0xff]  ;;  %v429_v39 = vld [vmem:[#allocation9 + $0xb0] sm:$0xff] }
  0x56   :  { %244 = vmatmul.mubr.f32.vlgmr.msra.gmra.mxu0 %v981_v2  ;;  %321 = vmatmul.mubr.f32.vlgmr.msra.gmra.mxu1 %v981_v2  ;;  %v446_v38 = vld [vmem:[#allocation9 + $0x138] sm:$0xff]  ;;  %v461_v40 = vld [vmem:[#allocation9 + $0x1b0] sm:$0xff]  ;;  %v428_v43 = vld [vmem:[#allocation9 + $0xa8] sm:$0xff] }
  0x57   :  { %249 = vmatprep.mubr.f32.mxu0 %v919_v0  ;;  %326 = vmatprep.mubr.f32.mxu1 %v919_v0  ;;  %v453_v0 = vld [vmem:[#allocation9 + $0x170] sm:$0xff]  ;;  %v460_v44 = vld [vmem:[#allocation9 + $0x1a8] sm:$0xff]  ;;  %v427_v47 = vld [vmem:[#allocation9 + $0xa0] sm:$0xff] }
  0x58   :  { %697 = vmatprep.subr.mxu0 %v438_v4  ;;  %735 = vmatprep.subr.mxu1 %v470_v5  ;;  %v413_v41 = vld [vmem:[#allocation9 + $0x30] sm:$0xff]  ;;  %v412_v45 = vld [vmem:[#allocation9 + $0x28] sm:$0xff]  ;;  %v459_v48 = vld [vmem:[#allocation9 + $0x1a0] sm:$0xff] }
  0x59   :  { %698 = vmatpush3.msra.mxu0 %v422_v6  ;;  %736 = vmatpush3.msra.mxu1 %v454_v7  ;;  %v445_v42 = vld [vmem:[#allocation9 + $0x130] sm:$0xff]  ;;  %v444_v46 = vld [vmem:[#allocation9 + $0x128] sm:$0xff]  ;;  %v411_v49 = vld [vmem:[#allocation9 + $0x20] sm:$0xff]  ;;  %v159_v6 = vlaneseq }
  0x5a   :  { %250 = vmatmul.mubr.f32.gmra.mxu0 %v987_v3  ;;  %327 = vmatmul.mubr.f32.gmra.mxu1 %v987_v3  ;;  %v443_v50 = vld [vmem:[#allocation9 + $0x120] sm:$0xff]  ;;  %v426_v51 = vld [vmem:[#allocation9 + $0x98] sm:$0xff]  ;;  %v425_v55 = vld [vmem:[#allocation9 + $0x90] sm:$0xff] }
  0x5b   :  { %699 = vmatprep.subr.mxu0 %v437_v8  ;;  %737 = vmatprep.subr.mxu1 %v469_v9  ;;  %v458_v52 = vld [vmem:[#allocation9 + $0x198] sm:$0xff]  ;;  %v457_v56 = vld [vmem:[#allocation9 + $0x190] sm:$0xff]  ;;  %v424_v59 = vld [vmem:[#allocation9 + $0x88] sm:$0xff]  ;;  %v160_v7 = vshrl.u32 %v159_v6, 7 }
  0x5c   :  { %700 = vmatpush3.msra.mxu0 %v421_v10  ;;  %738 = vmatpush3.msra.mxu1 %v453_v0  ;;  %v410_v53 = vld [vmem:[#allocation9 + $0x18] sm:$0xff]  ;;  %v409_v57 = vld [vmem:[#allocation9 + $0x10] sm:$0xff]  ;;  %v456_v60 = vld [vmem:[#allocation9 + $0x188] sm:$0xff] }
  0x5d   :  { %701 = vmatprep.subr.mxu0 %v436_v11  ;;  %739 = vmatprep.subr.mxu1 %v468_v12  ;;  %v442_v54 = vld [vmem:[#allocation9 + $0x118] sm:$0xff]  ;;  %v441_v58 = vld [vmem:[#allocation9 + $0x110] sm:$0xff]  ;;  %v408_v61 = vld [vmem:[#allocation9 + $0x8] sm:$0xff]  ;;  %v161_v8 = vsub.s32 0, %v160_v7  ;;  %v169_v9 = vsub.s32 2, %v160_v7  ;;  %v165_v0 = vsub.s32 1, %v160_v7 }
  0x5e   :  { %702 = vmatpush3.msra.mxu0 %v420_v13  ;;  %740 = vmatpush3.msra.mxu1 %v452_v14  ;;  %v440_v62 = vld [vmem:[#allocation9 + $0x108] sm:$0xff]  ;;  %v423_v63 = vld [vmem:[#allocation9 + $0x80] sm:$0xff]  ;;  %v157_v10 = vld [vmem:[#allocation8] sm:$0xf]  ;;  %v173_v11 = vsub.s32 3, %v160_v7 }
  0x5f   :  { %703 = vmatprep.subr.mxu0 %v435_v15  ;;  %741 = vmatprep.subr.mxu1 %v467_v16  ;;  %v455_v1 = vld [vmem:[#allocation9 + $0x180] sm:$0xff]  ;;  %v162_v12 = vrot.slane %v157_v10, %v161_v8  ;;  %v170_v13 = vrot.slane %v157_v10, %v169_v9  ;;  %v166_v16 = vrot.slane %v157_v10, %v165_v0 }
  0x60   :  { %704 = vmatpush3.msra.mxu0 %v419_v17  ;;  %742 = vmatpush3.msra.mxu1 %v451_v18  ;;  %v407_v4 = vld [vmem:[#allocation9] sm:$0xff]  ;;  %v174_v17 = vrot.slane %v157_v10, %v173_v11 }
  0x61   :  { %705 = vmatprep.subr.mxu0 %v434_v19  ;;  %743 = vmatprep.subr.mxu1 %v466_v20  ;;  %v439_v5 = vld [vmem:[#allocation9 + $0x100] sm:$0xff] }
  0x62   :  { %706 = vmatpush3.msra.mxu0 %v418_v21  ;;  %744 = vmatpush3.msra.mxu1 %v450_v22 }
  0x63   :  { %707 = vmatprep.subr.mxu0 %v433_v23  ;;  %745 = vmatprep.subr.mxu1 %v465_v24 }
  0x64   :  { %708 = vmatpush3.msra.mxu0 %v417_v25  ;;  %746 = vmatpush3.msra.mxu1 %v449_v26 }
  0x65   :  { %709 = vmatprep.subr.mxu0 %v432_v27  ;;  %747 = vmatprep.subr.mxu1 %v464_v28 }
  0x66   :  { %710 = vmatpush3.msra.mxu0 %v416_v29  ;;  %748 = vmatpush3.msra.mxu1 %v448_v30 }
  0x67   :  { %711 = vmatprep.subr.mxu0 %v431_v31  ;;  %749 = vmatprep.subr.mxu1 %v463_v32 }
  0x68   :  { %712 = vmatpush3.msra.mxu0 %v415_v33  ;;  %750 = vmatpush3.msra.mxu1 %v447_v34 }
  0x69   :  { %713 = vmatprep.subr.mxu0 %v430_v35  ;;  %751 = vmatprep.subr.mxu1 %v462_v36 }
  0x6a   :  { %714 = vmatpush3.msra.mxu0 %v414_v37  ;;  %752 = vmatpush3.msra.mxu1 %v446_v38 }
  0x6b   :  { %715 = vmatprep.subr.mxu0 %v429_v39  ;;  %753 = vmatprep.subr.mxu1 %v461_v40 }
  0x6c   :  { %716 = vmatpush3.msra.mxu0 %v413_v41  ;;  %754 = vmatpush3.msra.mxu1 %v445_v42 }
  0x6d   :  { %717 = vmatprep.subr.mxu0 %v428_v43  ;;  %755 = vmatprep.subr.mxu1 %v460_v44 }
  0x6e   :  { %718 = vmatpush3.msra.mxu0 %v412_v45  ;;  %756 = vmatpush3.msra.mxu1 %v444_v46 }
  0x6f   :  { %719 = vmatprep.subr.mxu0 %v427_v47  ;;  %757 = vmatprep.subr.mxu1 %v459_v48 }
  0x70   :  { %720 = vmatpush3.msra.mxu0 %v411_v49  ;;  %758 = vmatpush3.msra.mxu1 %v443_v50 }
  0x71   :  { %721 = vmatprep.subr.mxu0 %v426_v51  ;;  %759 = vmatprep.subr.mxu1 %v458_v52 }
  0x72   :  { %722 = vmatpush3.msra.mxu0 %v410_v53  ;;  %760 = vmatpush3.msra.mxu1 %v442_v54 }
  0x73   :  { %723 = vmatprep.subr.mxu0 %v425_v55  ;;  %761 = vmatprep.subr.mxu1 %v457_v56 }
  0x74   :  { %724 = vmatpush3.msra.mxu0 %v409_v57  ;;  %762 = vmatpush3.msra.mxu1 %v441_v58 }
  0x75   :  { %725 = vmatprep.subr.mxu0 %v424_v59  ;;  %763 = vmatprep.subr.mxu1 %v456_v60 }
  0x76   :  { %726 = vmatpush3.msra.mxu0 %v408_v61  ;;  %764 = vmatpush3.msra.mxu1 %v440_v62 }
  0x77   :  { %727 = vmatprep.subr.mxu0 %v423_v63  ;;  %765 = vmatprep.subr.mxu1 %v455_v1 }
  0x78   :  { %728 = vmatpush3.msra.mxu0 %v407_v4  ;;  %766 = vmatpush3.msra.mxu1 %v439_v5 }
 0x116   :  { %v245_v14 = vpop.f32.mrf.mxu0  ;;  %v322_v15 = vpop.f32.mrf.mxu1 }
 0x117   :  { %v991_v18 = vadd.f32 %v245_v14, %v162_v12  ;;  %v993_v19 = vadd.f32 %v322_v15, %v170_v13 }
 0x118   :  { %v247_v20 = vpop.f32.mrf.mxu0  ;;  %v324_v21 = vpop.f32.mrf.mxu1 }
 0x119   :  { %v341_v22 = vmul.f32 %v991_v18, %v991_v18  ;;  %v343_v23 = vmul.f32 %v993_v19, %v993_v19  ;;  %v248_v24 = vadd.f32 %v247_v20, %v166_v16  ;;  %v999_v25 = vadd.f32 %v324_v21, %v174_v17 }
 0x11a   :  { %v251_v26 = vpop.f32.mrf.mxu0  ;;  %v328_v27 = vpop.f32.mrf.mxu1  ;;  %v333_v21 = vmul.f32 0.5, %v991_v18 }
 0x11b   :  { %v349_v28 = vmul.f32 %v341_v22, %v991_v18  ;;  %v351_v29 = vmul.f32 %v343_v23, %v993_v19  ;;  %v1003_v30 = vadd.f32 %v251_v26, %v162_v12  ;;  %v1005_v31 = vadd.f32 %v328_v27, %v170_v13 }
 0x11c   :  { %v342_v32 = vmul.f32 %v248_v24, %v248_v24  ;;  %v344_v33 = vmul.f32 %v999_v25, %v999_v25  ;;  %v253_v34 = vpop.f32.mrf.mxu0  ;;  %v330_v35 = vpop.f32.mrf.mxu1  ;;  %v336_v22 = vmul.f32 0.5, %v999_v25  ;;  %v335_v27 = vmul.f32 0.5, %v993_v19 }
 0x11d   :  { %v357_v36 = vmul.f32 0.044715, %v349_v28  ;;  %v359_v37 = vmul.f32 0.044715, %v351_v29  ;;  %v345_v38 = vmul.f32 %v1003_v30, %v1003_v30  ;;  %v347_v39 = vmul.f32 %v1005_v31, %v1005_v31 }
 0x11e   :  { %v350_v40 = vmul.f32 %v342_v32, %v248_v24  ;;  %v352_v41 = vmul.f32 %v344_v33, %v999_v25  ;;  %v254_v42 = vadd.f32 %v253_v34, %v166_v16  ;;  %v1014_v43 = vadd.f32 %v330_v35, %v174_v17 }
 0x11f   :  { %v365_v44 = vadd.f32 %v357_v36, %v991_v18  ;;  %v367_v45 = vadd.f32 %v359_v37, %v993_v19  ;;  %v353_v46 = vmul.f32 %v345_v38, %v1003_v30  ;;  %v355_v47 = vmul.f32 %v347_v39, %v1005_v31 }
 0x120   :  { %v358_v48 = vmul.f32 0.044715, %v350_v40  ;;  %v360_v49 = vmul.f32 0.044715, %v352_v41  ;;  %v346_v50 = vmul.f32 %v254_v42, %v254_v42  ;;  %v348_v51 = vmul.f32 %v1014_v43, %v1014_v43 }
 0x121   :  { %v373_v52 = vmul.f32 0.7978846, %v365_v44  ;;  %v375_v53 = vmul.f32 0.7978846, %v367_v45  ;;  %v361_v54 = vmul.f32 0.044715, %v353_v46 }
 0x122   :  { %v366_v55 = vadd.f32 %v358_v48, %v248_v24  ;;  %v368_v56 = vadd.f32 %v360_v49, %v999_v25  ;;  %v363_v57 = vmul.f32 0.044715, %v355_v47  ;;  %v354_v58 = vmul.f32 %v346_v50, %v254_v42 }
 0x123   :  { %783 = vtanh.f32 %v373_v52  ;;  %v369_v59 = vadd.f32 %v361_v54, %v1003_v30  ;;  %v356_v60 = vmul.f32 %v348_v51, %v1014_v43  ;;  %v334_v16 = vmul.f32 0.5, %v248_v24 }
 0x124   :  { %785 = vtanh.f32 %v375_v53  ;;  %v374_v61 = vmul.f32 0.7978846, %v366_v55  ;;  %v376_v62 = vmul.f32 0.7978846, %v368_v56  ;;  %v371_v63 = vadd.f32 %v363_v57, %v1005_v31 }
 0x125   :  { %v377_v1 = vmul.f32 0.7978846, %v369_v59  ;;  %v362_v4 = vmul.f32 0.044715, %v354_v58  ;;  %v364_v5 = vmul.f32 0.044715, %v356_v60 }
 0x126   :  { %v379_v6 = vmul.f32 0.7978846, %v371_v63  ;;  %787 = vtanh.f32 %v374_v61  ;;  %v338_v24 = vmul.f32 0.5, %v254_v42  ;;  %v340_v18 = vmul.f32 0.5, %v1014_v43 }
 0x127   :  { %v370_v7 = vadd.f32 %v362_v4, %v254_v42  ;;  %v372_v8 = vadd.f32 %v364_v5, %v1014_v43  ;;  %789 = vtanh.f32 %v376_v62  ;;  %v337_v39 = vmul.f32 0.5, %v1003_v30  ;;  %v694_v42 = vld [vmem:[%s1054_s4] ss:$0 sm:$0xff] }
 0x128   :  { %791 = vtanh.f32 %v377_v1  ;;  %v339_v40 = vmul.f32 0.5, %v1005_v31  ;;  %v89_v30 = vadd.f32 %v694_v42, %v981_v2  ;;  %v90_v57 = vadd.f32 %v694_v42, %v987_v3 }
 0x129   :  { %v378_v9 = vmul.f32 0.7978846, %v370_v7  ;;  %v380_v10 = vmul.f32 0.7978846, %v372_v8  ;;  %793 = vtanh.f32 %v379_v6 }
 0x12b   :  { %795 = vtanh.f32 %v378_v9 }
 0x12c   :  { %797 = vtanh.f32 %v380_v10 }
 0x130   :  { %v784_v0 = vpop.eup %783 }
 0x131   :  { %v786_v11 = vpop.eup %785  ;;  %v389_v13 = vadd.f32 1.0, %v784_v0 }
 0x132   :  { %v391_v15 = vadd.f32 1.0, %v786_v11 }
 0x133   :  { %v788_v12 = vpop.eup %787  ;;  %v397_v29 = vmul.f32 %v389_v13, %v333_v21  ;;  %v696_v21 = vld [vmem:[%s1056_s6] ss:$0 sm:$0xff] }
 0x134   :  { %v790_v14 = vpop.eup %789  ;;  %v390_v17 = vadd.f32 1.0, %v788_v12  ;;  %v399_v34 = vmul.f32 %v391_v15, %v335_v27 }
 0x135   :  { %v792_v20 = vpop.eup %791  ;;  %v392_v23 = vadd.f32 1.0, %v790_v14 }
 0x136   :  { %v794_v26 = vpop.eup %793  ;;  %v398_v28 = vmul.f32 %v390_v17, %v334_v16  ;;  %v393_v35 = vadd.f32 1.0, %v792_v20  ;;  %v695_v17 = vld [vmem:[%s1055_s5] ss:$0 sm:$0xff] }
 0x137   :  { %v400_v32 = vmul.f32 %v392_v23, %v336_v22  ;;  %v395_v38 = vadd.f32 1.0, %v794_v26 }
 0x138   :  { %v796_v33 = vpop.eup %795  ;;  %535 = vmatprep.mubr.f32.mxu0 %v398_v28  ;;  %v401_v44 = vmul.f32 %v393_v35, %v337_v39 }
 0x139   :  { %v798_v36 = vpop.eup %797  ;;  %610 = vmatprep.mubr.f32.mxu1 %v400_v32  ;;  %536 = vmatmul.mubr.f32.vlgmr.msra.gmra.mxu0 %v397_v29  ;;  %v394_v37 = vadd.f32 1.0, %v796_v33  ;;  %v403_v45 = vmul.f32 %v395_v38, %v339_v40 }
 0x13a   :  { %611 = vmatmul.mubr.f32.vlgmr.msra.gmra.mxu1 %v399_v34  ;;  %v396_v25 = vadd.f32 1.0, %v798_v36 }
 0x13b   :  { %v402_v19 = vmul.f32 %v394_v37, %v338_v24 }
 0x13c   :  { %v404_v41 = vmul.f32 %v396_v25, %v340_v18 }
 0x13d   :  { %540 = vmatprep.mubr.f32.mxu0 %v402_v19 }
 0x13e   :  { %615 = vmatprep.mubr.f32.mxu1 %v404_v41  ;;  %541 = vmatmul.mubr.f32.gmra.mxu0 %v401_v44 }
 0x13f   :  { %616 = vmatmul.mubr.f32.gmra.mxu1 %v403_v45 }
 0x1f9   :  { %v729_v46 = vpop.f32.mrf.mxu0 }
 0x1fa   :  { %v767_v47 = vpop.f32.mrf.mxu1 }
 0x1fb   :  { %v730_v43 = vpop.f32.mrf.mxu0 }
 0x1fc   :  { %v731_v48 = vadd.f32 %v730_v43, %v729_v46  ;;  %v768_v49 = vpop.f32.mrf.mxu1 }
 0x1fd   :  { %v769_v50 = vadd.f32 %v768_v49, %v767_v47 }
 0x1fe   :  { %v732_v31 = vpop.f32.mrf.mxu0 }
 0x1ff   :  { %v613_v51 = vadd.f32 %v769_v50, %v731_v48  ;;  %v770_v52 = vpop.f32.mrf.mxu1 }
 0x200   :  { %v733_v53 = vpop.f32.mrf.mxu0 }
 0x201   :  { %v734_v54 = vadd.f32 %v733_v53, %v732_v31  ;;  %v771_v55 = vpop.f32.mrf.mxu1  ;;  %v621_v56 = vadd.f32 %v613_v51, %v89_v30 }
 0x202   :  { %v772_v58 = vadd.f32 %v771_v55, %v770_v52 }
 0x203   :  { %627 = vadd.xlane.f32.xlu0 %v621_v56  ;;  %v631_v59 = vmul.f32 %v621_v56, %v621_v56 }
 0x204   :  { %v618_v60 = vadd.f32 %v772_v58, %v734_v54 }
 0x205   :  { %633 = vadd.xlane.f32.xlu1 %v631_v59 }
 0x206   :  { %v622_v61 = vadd.f32 %v618_v60, %v90_v57 }
 0x208   :  { %629 = vadd.xlane.f32.xlu0 %v622_v61  ;;  %v632_v62 = vmul.f32 %v622_v61, %v622_v61 }
 0x20a   :  { %635 = vadd.xlane.f32.xlu1 %v632_v62 }
 0x28c   :  { %v628_v2 = vpop.xlane.xlu0 %627 }
 0x28d   :  { %v637_v63 = vmul.f32 0.0078125, %v628_v2 }
 0x28e   :  { %v634_v1 = vpop.xlane.xlu1 %633 }
 0x28f   :  { %v641_v4 = vmul.f32 %v637_v63, %v637_v63  ;;  %v639_v5 = vmul.f32 0.0078125, %v634_v1  ;;  %v647_v15 = vsub.f32 %v621_v56, %v637_v63 }
 0x291   :  { %v643_v6 = vsub.f32 %v639_v5, %v641_v4  ;;  %v630_v7 = vpop.xlane.xlu0 %629 }
 0x292   :  { %v638_v8 = vmul.f32 0.0078125, %v630_v7 }
 0x293   :  { %v645_v9 = vmax.f32 %v643_v6, 0.0  ;;  %v636_v10 = vpop.xlane.xlu1 %635 }
 0x294   :  { %v642_v3 = vmul.f32 %v638_v8, %v638_v8  ;;  %v640_v0 = vmul.f32 0.0078125, %v636_v10  ;;  %v648_v23 = vsub.f32 %v622_v61, %v638_v8 }
 0x295   :  { %v649_v11 = vadd.f32 1e-12, %v645_v9 }
 0x296   :  { %v644_v12 = vsub.f32 %v640_v0, %v642_v3 }
 0x297   :  { %799 = vrsqrt.f32 %v649_v11 }
 0x298   :  { %v646_v13 = vmax.f32 %v644_v12, 0.0 }
 0x29a   :  { %v650_v14 = vadd.f32 1e-12, %v646_v13 }
 0x29c   :  { %801 = vrsqrt.f32 %v650_v14 }
 0x2a4   :  { %v800_v16 = vpop.eup %799 }
 0x2a5   :  { %v653_v20 = vmul.f32 %v800_v16, %v647_v15 }
 0x2a7   :  { %v662_v22 = vmul.f32 %v695_v17, %v653_v20 }
 0x2a9   :  { %v802_v26 = vpop.eup %801  ;;  %v671_v27 = vadd.f32 %v696_v21, %v662_v22 }
 0x2aa   :  { %v654_v28 = vmul.f32 %v802_v26, %v648_v23 }
 0x2ab   :  { %673 = vst [vmem:[#allocation11] sm:$0xff] %v671_v27 }
 0x2ac   :  { %v663_v29 = vmul.f32 %v695_v17, %v654_v28 }
 0x2ae   :  { %v672_v32 = vadd.f32 %v696_v21, %v663_v29 }
 0x2b0   :  { %674 = vst [vmem:[#allocation11 + $0x8] sm:$0xff] %v672_v32 }
 0x2b1   :  { %894 = shalt.err (!%p891_p10)
}
 0x2b2   :  { %686 = dma.vmem_to_hbm [thread:$0]  %s681_s27, 256, %s1057_s7, [#allocation5], %s915_s11, %s915_s11, %s916_s12  }
 0x2b3   :  { %909 = dma.done.wait [#allocation5], 256  }
 0x2b4   :  { %910 = vsyncadd [#allocation5], 4294967040 }
 0x2b5   :  { %690 = vsyncpa [#allocation4], 1 }
 0x2b6   :  { %691 = vsyncpa [#allocation7], 1 }
 0x2b7   :  { %692 = vsyncpa [#allocation10], 1 }
 0x2b8   :  { %693 = vsyncpa [#allocation5], 1 }

</bundles_post_ra>
